<compile_context>
chip_gen: v7x
topology: tpu7x:2x2x1
jax: 0.10.0
libtpu: 0.0.40
codegen_flags: <defaults>
</compile_context>

<pallas_src>
import math

import jax
import jax.numpy as jnp
from jax.experimental import pallas as pl
from jax.experimental.pallas import tpu as pltpu

INPUT_DIM = 64          # Encoder(input_dim=...) — configurable; demo uses 64
OUT_DIM = 64            # Encoder default out_dim
H1, H2, H3, H4 = 256, 512, 256, 128

DEFAULT_BLOCK_ROWS = 512   # batch tile (rows); 256–1024 amortizes per-step overhead


def encoder_kernel(slopes_ref,                               # (4,) f32 in SMEM
                   x_ref,                                    # (TB, D_in)
                   w1_ref, b1_ref, w2_ref, b2_ref,
                   w3_ref, b3_ref, w4_ref, b4_ref,
                   w5_ref, b5_ref,
                   o_ref):                                   # (TB, D_out) f32
    bf16 = jnp.bfloat16

    def prelu(h, a):
        # h is f32; a is an f32 scalar slope (PyTorch PReLU default init 0.25)
        return jnp.where(h >= 0, h, a * h)

    # linear1 + PReLU1
    h = jnp.dot(x_ref[...].astype(bf16), w1_ref[...],
                preferred_element_type=jnp.float32) + b1_ref[...]
    h = prelu(h, slopes_ref[0])

    # linear2 + PReLU2   (dropout p=0.0 -> identity)
    h = jnp.dot(h.astype(bf16), w2_ref[...],
                preferred_element_type=jnp.float32) + b2_ref[...]
    h = prelu(h, slopes_ref[1])

    # linear3 + PReLU3
    h = jnp.dot(h.astype(bf16), w3_ref[...],
                preferred_element_type=jnp.float32) + b3_ref[...]
    h = prelu(h, slopes_ref[2])

    # linear4 + PReLU4
    h = jnp.dot(h.astype(bf16), w4_ref[...],
                preferred_element_type=jnp.float32) + b4_ref[...]
    h = prelu(h, slopes_ref[3])

    # linear5 + tanh(x/20)*24
    h = jnp.dot(h.astype(bf16), w5_ref[...],
                preferred_element_type=jnp.float32) + b5_ref[...]
    o_ref[...] = (jnp.tanh(h * (1.0 / 20.0)) * 24.0).astype(o_ref.dtype)


def _choose_block_rows(batch, block_rows):
    # Multiple of 8 (sublane), capped; a partial last tile is handled by Pallas.
    return min(block_rows, max(8, ((batch + 7) // 8) * 8))


def encoder_forward(x, params, *, block_rows=DEFAULT_BLOCK_ROWS):
    """x: (B, input_dim) float32.  params: dict from init_params()."""
    batch, d_in = x.shape
    d_out = params["w5"].shape[1]
    tb = _choose_block_rows(batch, block_rows)
    grid = (pl.cdiv(batch, tb),)

    weight_names = ("w1", "b1", "w2", "b2", "w3", "b3", "w4", "b4", "w5", "b5")

    # Small scalar table -> SMEM, untiled.
    slopes_spec = pl.BlockSpec(memory_space=pltpu.MemorySpace.SMEM)
    # Batch-tiled activations.
    x_spec = pl.BlockSpec((tb, d_in), lambda i: (i, 0))
    out_spec = pl.BlockSpec((tb, d_out), lambda i: (i, 0))
    # Weights/biases: constant index_map -> VMEM-resident, DMA'd once.
    weight_specs = [pl.BlockSpec(tuple(params[n].shape), lambda i: (0, 0))
                    for n in weight_names]

    flops = 2 * batch * (d_in * H1 + H1 * H2 + H2 * H3 + H3 * H4 + H4 * d_out)
    bytes_accessed = (
        x.size * x.dtype.itemsize
        + batch * d_out * 4
        + sum(int(params[n].size) * params[n].dtype.itemsize for n in weight_names)
        + int(params["slopes"].size) * 4
    )

    out = pl.pallas_call(
        encoder_kernel,
        out_shape=jax.ShapeDtypeStruct((batch, d_out), jnp.float32),
        grid=grid,
        in_specs=[slopes_spec, x_spec] + weight_specs,
        out_specs=out_spec,
        compiler_params=pltpu.CompilerParams(
            dimension_semantics=("parallel",),      # shard batch axis across TCs (v7x)
        ),
        cost_estimate=pl.CostEstimate(
            flops=flops,
            transcendentals=batch * d_out,          # tanh
            bytes_accessed=bytes_accessed,
        ),
    )(params["slopes"], x,
      params["w1"], params["b1"], params["w2"], params["b2"],
      params["w3"], params["b3"], params["w4"], params["b4"],
      params["w5"], params["b5"])

    # matches x.squeeze() in the torch module (drops batch dim when B == 1)
    return jnp.squeeze(out)


def init_params(key, input_dim=INPUT_DIM, out_dim=OUT_DIM):
    """PyTorch-default-style init: U(-1/sqrt(fan_in), +1/sqrt(fan_in)).

    Weights are stored pre-transposed (in, out) and cast to bf16 (MXU-native,
    halves the resident/streamed weight bytes); biases and PReLU slopes stay f32.
    """
    layer_dims = [(input_dim, H1), (H1, H2), (H2, H3), (H3, H4), (H4, out_dim)]
    keys = jax.random.split(key, 2 * len(layer_dims))
    params = {}
    for idx, (fan_in, fan_out) in enumerate(layer_dims):
        bound = 1.0 / math.sqrt(fan_in)
        w = jax.random.uniform(keys[2 * idx], (fan_in, fan_out),
                               jnp.float32, -bound, bound)
        b = jax.random.uniform(keys[2 * idx + 1], (1, fan_out),
                               jnp.float32, -bound, bound)
        params[f"w{idx + 1}"] = w.astype(jnp.bfloat16)
        params[f"b{idx + 1}"] = b
    params["slopes"] = jnp.full((4,), 0.25, jnp.float32)   # PReLU default slopes
    return params


def reference_forward(x, params):
    """Plain-JAX f32 reference (weights up-cast) for the correctness check."""
    s = params["slopes"]

    def prelu(h, a):
        return jnp.where(h >= 0, h, a * h)

    f32 = jnp.float32
    h = x @ params["w1"].astype(f32) + params["b1"]
    h = prelu(h, s[0])
    h = h @ params["w2"].astype(f32) + params["b2"]
    h = prelu(h, s[1])
    h = h @ params["w3"].astype(f32) + params["b3"]
    h = prelu(h, s[2])
    h = h @ params["w4"].astype(f32) + params["b4"]
    h = prelu(h, s[3])
    h = h @ params["w5"].astype(f32) + params["b5"]
    return jnp.squeeze(jnp.tanh(h / 20.0) * 24.0)


if __name__ == "__main__":
    key = jax.random.PRNGKey(0)
    kp, kx = jax.random.split(key)

    params = init_params(kp, input_dim=INPUT_DIM, out_dim=OUT_DIM)
    batch = 8
    x = jax.random.normal(kx, (batch, INPUT_DIM), jnp.float32)

    out = encoder_forward(x, params)
    out = jax.block_until_ready(out)

    ref = reference_forward(x, params)
    assert out.shape == (batch, OUT_DIM), out.shape
    # bf16 matmul operands vs f32 reference: tolerance loosened accordingly
    # (output is bounded by tanh*24, so absolute error stays small).
    assert jnp.allclose(out, ref, atol=1e-1, rtol=5e-2), "mismatch vs reference"

    print("KERNEL_OK")
</pallas_src>

<mosaic_0001>
module attributes {stable_mosaic.version = 11 : i64} {
  func.func @encoder_kernel(%arg0: i32, %arg1: memref<4xf32, #tpu.memory_space<smem>>, %arg2: memref<8x64xf32, #tpu.memory_space<vmem>>, %arg3: memref<64x256xbf16, #tpu.memory_space<vmem>>, %arg4: memref<1x256xf32, #tpu.memory_space<vmem>>, %arg5: memref<256x512xbf16, #tpu.memory_space<vmem>>, %arg6: memref<1x512xf32, #tpu.memory_space<vmem>>, %arg7: memref<512x256xbf16, #tpu.memory_space<vmem>>, %arg8: memref<1x256xf32, #tpu.memory_space<vmem>>, %arg9: memref<256x128xbf16, #tpu.memory_space<vmem>>, %arg10: memref<1x128xf32, #tpu.memory_space<vmem>>, %arg11: memref<128x64xbf16, #tpu.memory_space<vmem>>, %arg12: memref<1x64xf32, #tpu.memory_space<vmem>>, %arg13: memref<8x64xf32, #tpu.memory_space<vmem>>) attributes {dimension_semantics = [#tpu.dimension_semantics<parallel>], iteration_bounds = array<i64: 1>, scalar_prefetch = 0 : i64, scratch_operands = 0 : i64, tpu.core_type = #tpu.core_type<tc>, window_params = [{transform_indices = @transform_0, window_bounds = array<i64: 4>}, {transform_indices = @transform_1, window_bounds = array<i64: 8, 64>}, {pipeline_mode = #tpu.pipeline_mode<synchronous>, transform_indices = @transform_2, window_bounds = array<i64: 64, 256>}, {pipeline_mode = #tpu.pipeline_mode<synchronous>, transform_indices = @transform_3, window_bounds = array<i64: 1, 256>}, {pipeline_mode = #tpu.pipeline_mode<synchronous>, transform_indices = @transform_4, window_bounds = array<i64: 256, 512>}, {pipeline_mode = #tpu.pipeline_mode<synchronous>, transform_indices = @transform_5, window_bounds = array<i64: 1, 512>}, {pipeline_mode = #tpu.pipeline_mode<synchronous>, transform_indices = @transform_6, window_bounds = array<i64: 512, 256>}, {pipeline_mode = #tpu.pipeline_mode<synchronous>, transform_indices = @transform_7, window_bounds = array<i64: 1, 256>}, {pipeline_mode = #tpu.pipeline_mode<synchronous>, transform_indices = @transform_8, window_bounds = array<i64: 256, 128>}, {pipeline_mode = #tpu.pipeline_mode<synchronous>, transform_indices = @transform_9, window_bounds = array<i64: 1, 128>}, {pipeline_mode = #tpu.pipeline_mode<synchronous>, transform_indices = @transform_10, window_bounds = array<i64: 128, 64>}, {pipeline_mode = #tpu.pipeline_mode<synchronous>, transform_indices = @transform_11, window_bounds = array<i64: 1, 64>}, {transform_indices = @transform_12, window_bounds = array<i64: 8, 64>}]} {
    %c0 = arith.constant 0 : index
    %c0_0 = arith.constant 0 : index
    %0 = vector.load %arg2[%c0, %c0_0] : memref<8x64xf32, #tpu.memory_space<vmem>>, vector<8x64xf32>
    %1 = arith.truncf %0 : vector<8x64xf32> to vector<8x64xbf16>
    %c0_1 = arith.constant 0 : index
    %c0_2 = arith.constant 0 : index
    %2 = vector.load %arg3[%c0_1, %c0_2] : memref<64x256xbf16, #tpu.memory_space<vmem>>, vector<64x256xbf16>
    %cst = arith.constant dense<0.000000e+00> : vector<8x256xf32>
    %3 = tpu.matmul %1, %2, %cst {dimension_numbers = #tpu.dot_dimension_numbers<[1], [0], [0], [1], [0, 0, 1, 1], [], []>} : vector<8x64xbf16>, vector<64x256xbf16>, vector<8x256xf32> -> vector<8x256xf32>
    %c0_3 = arith.constant 0 : index
    %c0_4 = arith.constant 0 : index
    %4 = vector.load %arg4[%c0_3, %c0_4] : memref<1x256xf32, #tpu.memory_space<vmem>>, vector<1x256xf32>
    %5 = vector.broadcast %4 : vector<1x256xf32> to vector<8x256xf32>
    %6 = arith.addf %3, %5 : vector<8x256xf32>
    %c0_5 = arith.constant 0 : index
    %7 = memref.load %arg1[%c0_5] : memref<4xf32, #tpu.memory_space<smem>>
    %cst_6 = arith.constant 0.000000e+00 : f32
    %8 = vector.broadcast %cst_6 : f32 to vector<8x256xf32>
    %9 = arith.cmpf oge, %6, %8 : vector<8x256xf32>
    %10 = vector.broadcast %7 : f32 to vector<8x256xf32>
    %11 = arith.mulf %10, %6 : vector<8x256xf32>
    %12 = arith.select %9, %6, %11 : vector<8x256xi1>, vector<8x256xf32>
    %13 = arith.truncf %12 : vector<8x256xf32> to vector<8x256xbf16>
    %c0_7 = arith.constant 0 : index
    %c0_8 = arith.constant 0 : index
    %14 = vector.load %arg5[%c0_7, %c0_8] : memref<256x512xbf16, #tpu.memory_space<vmem>>, vector<256x512xbf16>
    %cst_9 = arith.constant dense<0.000000e+00> : vector<8x512xf32>
    %15 = tpu.matmul %13, %14, %cst_9 {dimension_numbers = #tpu.dot_dimension_numbers<[1], [0], [0], [1], [0, 0, 1, 1], [], []>} : vector<8x256xbf16>, vector<256x512xbf16>, vector<8x512xf32> -> vector<8x512xf32>
    %c0_10 = arith.constant 0 : index
    %c0_11 = arith.constant 0 : index
    %16 = vector.load %arg6[%c0_10, %c0_11] : memref<1x512xf32, #tpu.memory_space<vmem>>, vector<1x512xf32>
    %17 = vector.broadcast %16 : vector<1x512xf32> to vector<8x512xf32>
    %18 = arith.addf %15, %17 : vector<8x512xf32>
    %c1 = arith.constant 1 : index
    %19 = memref.load %arg1[%c1] : memref<4xf32, #tpu.memory_space<smem>>
    %cst_12 = arith.constant 0.000000e+00 : f32
    %20 = vector.broadcast %cst_12 : f32 to vector<8x512xf32>
    %21 = arith.cmpf oge, %18, %20 : vector<8x512xf32>
    %22 = vector.broadcast %19 : f32 to vector<8x512xf32>
    %23 = arith.mulf %22, %18 : vector<8x512xf32>
    %24 = arith.select %21, %18, %23 : vector<8x512xi1>, vector<8x512xf32>
    %25 = arith.truncf %24 : vector<8x512xf32> to vector<8x512xbf16>
    %c0_13 = arith.constant 0 : index
    %c0_14 = arith.constant 0 : index
    %26 = vector.load %arg7[%c0_13, %c0_14] : memref<512x256xbf16, #tpu.memory_space<vmem>>, vector<512x256xbf16>
    %cst_15 = arith.constant dense<0.000000e+00> : vector<8x256xf32>
    %27 = tpu.matmul %25, %26, %cst_15 {dimension_numbers = #tpu.dot_dimension_numbers<[1], [0], [0], [1], [0, 0, 1, 1], [], []>} : vector<8x512xbf16>, vector<512x256xbf16>, vector<8x256xf32> -> vector<8x256xf32>
    %c0_16 = arith.constant 0 : index
    %c0_17 = arith.constant 0 : index
    %28 = vector.load %arg8[%c0_16, %c0_17] : memref<1x256xf32, #tpu.memory_space<vmem>>, vector<1x256xf32>
    %29 = vector.broadcast %28 : vector<1x256xf32> to vector<8x256xf32>
    %30 = arith.addf %27, %29 : vector<8x256xf32>
    %c2 = arith.constant 2 : index
    %31 = memref.load %arg1[%c2] : memref<4xf32, #tpu.memory_space<smem>>
    %cst_18 = arith.constant 0.000000e+00 : f32
    %32 = vector.broadcast %cst_18 : f32 to vector<8x256xf32>
    %33 = arith.cmpf oge, %30, %32 : vector<8x256xf32>
    %34 = vector.broadcast %31 : f32 to vector<8x256xf32>
    %35 = arith.mulf %34, %30 : vector<8x256xf32>
    %36 = arith.select %33, %30, %35 : vector<8x256xi1>, vector<8x256xf32>
    %37 = arith.truncf %36 : vector<8x256xf32> to vector<8x256xbf16>
    %c0_19 = arith.constant 0 : index
    %c0_20 = arith.constant 0 : index
    %38 = vector.load %arg9[%c0_19, %c0_20] : memref<256x128xbf16, #tpu.memory_space<vmem>>, vector<256x128xbf16>
    %cst_21 = arith.constant dense<0.000000e+00> : vector<8x128xf32>
    %39 = tpu.matmul %37, %38, %cst_21 {dimension_numbers = #tpu.dot_dimension_numbers<[1], [0], [0], [1], [0, 0, 1, 1], [], []>} : vector<8x256xbf16>, vector<256x128xbf16>, vector<8x128xf32> -> vector<8x128xf32>
    %c0_22 = arith.constant 0 : index
    %c0_23 = arith.constant 0 : index
    %40 = vector.load %arg10[%c0_22, %c0_23] : memref<1x128xf32, #tpu.memory_space<vmem>>, vector<1x128xf32>
    %41 = vector.broadcast %40 : vector<1x128xf32> to vector<8x128xf32>
    %42 = arith.addf %39, %41 : vector<8x128xf32>
    %c3 = arith.constant 3 : index
    %43 = memref.load %arg1[%c3] : memref<4xf32, #tpu.memory_space<smem>>
    %cst_24 = arith.constant 0.000000e+00 : f32
    %44 = vector.broadcast %cst_24 : f32 to vector<8x128xf32>
    %45 = arith.cmpf oge, %42, %44 : vector<8x128xf32>
    %46 = vector.broadcast %43 : f32 to vector<8x128xf32>
    %47 = arith.mulf %46, %42 : vector<8x128xf32>
    %48 = arith.select %45, %42, %47 : vector<8x128xi1>, vector<8x128xf32>
    %49 = arith.truncf %48 : vector<8x128xf32> to vector<8x128xbf16>
    %c0_25 = arith.constant 0 : index
    %c0_26 = arith.constant 0 : index
    %50 = vector.load %arg11[%c0_25, %c0_26] : memref<128x64xbf16, #tpu.memory_space<vmem>>, vector<128x64xbf16>
    %cst_27 = arith.constant dense<0.000000e+00> : vector<8x64xf32>
    %51 = tpu.matmul %49, %50, %cst_27 {dimension_numbers = #tpu.dot_dimension_numbers<[1], [0], [0], [1], [0, 0, 1, 1], [], []>} : vector<8x128xbf16>, vector<128x64xbf16>, vector<8x64xf32> -> vector<8x64xf32>
    %c0_28 = arith.constant 0 : index
    %c0_29 = arith.constant 0 : index
    %52 = vector.load %arg12[%c0_28, %c0_29] : memref<1x64xf32, #tpu.memory_space<vmem>>, vector<1x64xf32>
    %53 = vector.broadcast %52 : vector<1x64xf32> to vector<8x64xf32>
    %54 = arith.addf %51, %53 : vector<8x64xf32>
    %cst_30 = arith.constant 5.000000e-02 : f32
    %55 = vector.broadcast %cst_30 : f32 to vector<8x64xf32>
    %56 = arith.mulf %54, %55 : vector<8x64xf32>
    %57 = math.tanh %56 : vector<8x64xf32>
    %cst_31 = arith.constant 2.400000e+01 : f32
    %58 = vector.broadcast %cst_31 : f32 to vector<8x64xf32>
    %59 = arith.mulf %57, %58 : vector<8x64xf32>
    %c0_32 = arith.constant 0 : index
    %c0_33 = arith.constant 0 : index
    %60 = vector.load %arg13[%c0_32, %c0_33] : memref<8x64xf32, #tpu.memory_space<vmem>>, vector<8x64xf32>
    tpu.vector_store %arg13[%c0_32, %c0_33], %59 {strides = array<i32>} : memref<8x64xf32, #tpu.memory_space<vmem>>, vector<8x64xf32>,
    return
  }
  func.func @transform_0(%arg0: i32) -> i32 {
    %c0_i32 = arith.constant 0 : i32
    %c0_i32_0 = arith.constant 0 : i32
    return %c0_i32 : i32
  }
  func.func @transform_1(%arg0: i32) -> (i32, i32) {
    %c0_i32 = arith.constant 0 : i32
    %c0_i32_0 = arith.constant 0 : i32
    return %arg0, %c0_i32 : i32, i32
  }
  func.func @transform_2(%arg0: i32) -> (i32, i32) {
    %c0_i32 = arith.constant 0 : i32
    %c0_i32_0 = arith.constant 0 : i32
    %c0_i32_1 = arith.constant 0 : i32
    return %c0_i32, %c0_i32_0 : i32, i32
  }
  func.func @transform_3(%arg0: i32) -> (i32, i32) {
    %c0_i32 = arith.constant 0 : i32
    %c0_i32_0 = arith.constant 0 : i32
    %c0_i32_1 = arith.constant 0 : i32
    return %c0_i32, %c0_i32_0 : i32, i32
  }
  func.func @transform_4(%arg0: i32) -> (i32, i32) {
    %c0_i32 = arith.constant 0 : i32
    %c0_i32_0 = arith.constant 0 : i32
    %c0_i32_1 = arith.constant 0 : i32
    return %c0_i32, %c0_i32_0 : i32, i32
  }
  func.func @transform_5(%arg0: i32) -> (i32, i32) {
    %c0_i32 = arith.constant 0 : i32
    %c0_i32_0 = arith.constant 0 : i32
    %c0_i32_1 = arith.constant 0 : i32
    return %c0_i32, %c0_i32_0 : i32, i32
  }
  func.func @transform_6(%arg0: i32) -> (i32, i32) {
    %c0_i32 = arith.constant 0 : i32
    %c0_i32_0 = arith.constant 0 : i32
    %c0_i32_1 = arith.constant 0 : i32
    return %c0_i32, %c0_i32_0 : i32, i32
  }
  func.func @transform_7(%arg0: i32) -> (i32, i32) {
    %c0_i32 = arith.constant 0 : i32
    %c0_i32_0 = arith.constant 0 : i32
    %c0_i32_1 = arith.constant 0 : i32
    return %c0_i32, %c0_i32_0 : i32, i32
  }
  func.func @transform_8(%arg0: i32) -> (i32, i32) {
    %c0_i32 = arith.constant 0 : i32
    %c0_i32_0 = arith.constant 0 : i32
    %c0_i32_1 = arith.constant 0 : i32
    return %c0_i32, %c0_i32_0 : i32, i32
  }
  func.func @transform_9(%arg0: i32) -> (i32, i32) {
    %c0_i32 = arith.constant 0 : i32
    %c0_i32_0 = arith.constant 0 : i32
    %c0_i32_1 = arith.constant 0 : i32
    return %c0_i32, %c0_i32_0 : i32, i32
  }
  func.func @transform_10(%arg0: i32) -> (i32, i32) {
    %c0_i32 = arith.constant 0 : i32
    %c0_i32_0 = arith.constant 0 : i32
    %c0_i32_1 = arith.constant 0 : i32
    return %c0_i32, %c0_i32_0 : i32, i32
  }
  func.func @transform_11(%arg0: i32) -> (i32, i32) {
    %c0_i32 = arith.constant 0 : i32
    %c0_i32_0 = arith.constant 0 : i32
    %c0_i32_1 = arith.constant 0 : i32
    return %c0_i32, %c0_i32_0 : i32, i32
  }
  func.func @transform_12(%arg0: i32) -> (i32, i32) {
    %c0_i32 = arith.constant 0 : i32
    %c0_i32_0 = arith.constant 0 : i32
    return %arg0, %c0_i32 : i32, i32
  }
}

</mosaic_0001>

<bundles_post_ra>
// kernel: tpu_custom_call.1
= control target key start
LH: loop header
LB: loop body
LE: loop exit
PB: predicated region body
PF: predicated region fallthrough
CT: control target
= control target key end

     0   :  { %17 = vsyncpa [#allocation5], 0  ;;  %s2314_s0 = inlined_call_operand.vmem [shape: f32[4], index: 0, kind: input, shape index: {}]   ;;  %s2315_s1 = inlined_call_operand.vmem [shape: f32[8,64], index: 1, kind: input, shape index: {}]   ;;  %s2316_s2 = inlined_call_operand.vmem [shape: bf16[64,256], index: 2, kind: input, shape index: {}]   ;;  %s2317_s3 = inlined_call_operand.vmem [shape: f32[1,256], index: 3, kind: input, shape index: {}]   ;;  %s2318_s4 = inlined_call_operand.hbm [shape: bf16[256,512], index: 4, kind: input, shape index: {}]   ;;  %s2319_s5 = inlined_call_operand.vmem [shape: f32[1,512], index: 5, kind: input, shape index: {}]   ;;  %s2320_s6 = inlined_call_operand.hbm [shape: bf16[512,256], index: 6, kind: input, shape index: {}]   ;;  %s2321_s7 = inlined_call_operand.vmem [shape: f32[1,256], index: 7, kind: input, shape index: {}]   ;;  %s2322_s8 = inlined_call_operand.hbm [shape: bf16[256,128], index: 8, kind: input, shape index: {}]   ;;  %s2323_s9 = inlined_call_operand.vmem [shape: f32[1,128], index: 9, kind: input, shape index: {}]   ;;  %s2324_s10 = inlined_call_operand.vmem [shape: bf16[128,64], index: 10, kind: input, shape index: {}]   ;;  %s2325_s11 = inlined_call_operand.vmem [shape: f32[1,64], index: 11, kind: input, shape index: {}]   ;;  %s2326_s12 = inlined_call_operand.hbm [shape: f32[8,64], index: 12, kind: output, shape index: {}]  }
   0x1   :  { %18 = vsyncpa [#allocation3], 0 }
   0x2   :  { %19 = vsyncpa [#allocation8], 0 }
   0x3   :  { %20 = vsyncpa [#allocation4], 0  ;;  %s2096_s21 = smov [#allocation7]   ;;  %s27_s25 = sshll.u32 %s2314_s0, 4  ;;  %s28_s25 = int_to_ptr.vmem [resolvable:$true] %s27_s25 }
   0x4   :  { %s56_s22 = sshll.u32 %s2096_s21, 4  ;;  %s1988_s28 = scalar_lea.hbm %s2320_s6, 8192  ;;  %s57_s22 = int_to_ptr.vmem [resolvable:$true] %s56_s22 }
   0x5   :  { %p1989_p0 = scmp.ne.s32.totalorder %s2320_s6, %s1988_s28  ;;  %p1992_p1 = scmp.lt.u32.totalorder %s1988_s28, %s2320_s6 }
   0x7   :  { %p1994_p2 = pnand %p1992_p1, %p1989_p0 }
   0x9   :  { %1997 = shalt.err (!%p1994_p2)
}
   0xa   :  { %s1998_s15 = scalar_lea.vmem %s57_s22, 8192  ;;  %p2003_p4 = scmp.lt.s32.totalorder %s57_s22, %s57_s22 }
   0xb   :  { %p1999_p3 = scmp.ne.s32.totalorder %s57_s22, %s1998_s15  ;;  %p2004_p5 = scmp.lt.s32.totalorder %s1998_s15, %s1998_s15 }
   0xd   :  { %p2005_p6 = por %p2004_p5, %p2003_p4 }
   0xf   :  { %p2006_p7 = pnand %p2005_p6, %p1999_p3 }
  0x11   :  { %2009 = shalt.err (!%p2006_p7)
}
  0x12   :  { %s2097_s0 = smov 128   ;;  %s2098_s16 = smov 8  }
  0x13   :  { %62 = dma.hbm_to_vmem [thread:$0]  %s2320_s6, 8192, %s57_s22, [#allocation8], %s2097_s0, %s2097_s0, %s2098_s16  }
  0x14   :  { %s2010_s19 = scalar_lea.vmem %s28_s25, 16  ;;  %p2015_p9 = scmp.lt.s32.totalorder %s28_s25, %s28_s25 }
  0x15   :  { %p2011_p8 = scmp.ne.s32.totalorder %s28_s25, %s2010_s19  ;;  %p2016_p10 = scmp.lt.s32.totalorder %s2010_s19, %s2010_s19 }
  0x17   :  { %p2017_p11 = por %p2016_p10, %p2015_p9 }
  0x19   :  { %p2018_p12 = pnand %p2017_p11, %p2011_p8 }
  0x1b   :  { %2021 = shalt.err (!%p2018_p12)
}
  0x1c   :  { %s2099_s20 = smov [#allocation2]   ;;  %s2100_s21 = smov [#allocation6]  }
  0x1d   :  { %30 = dma.vmem_to_smem %s28_s25, 16, %s2099_s20, [#allocation5]  }
  0x1e   :  { %s42_s23 = sshll.u32 %s2100_s21, 4  ;;  %s2022_s27 = scalar_lea.hbm %s2318_s4, 8192  ;;  %s43_s23 = int_to_ptr.vmem [resolvable:$true] %s42_s23 }
  0x1f   :  { %p2023_p13 = scmp.ne.s32.totalorder %s2318_s4, %s2022_s27  ;;  %p2026_p0 = scmp.lt.u32.totalorder %s2022_s27, %s2318_s4 }
  0x21   :  { %p2028_p1 = pnand %p2026_p0, %p2023_p13 }
  0x23   :  { %2031 = shalt.err (!%p2028_p1)
}
  0x24   :  { %s2032_s30 = scalar_lea.vmem %s43_s23, 8192  ;;  %p2037_p3 = scmp.lt.s32.totalorder %s43_s23, %s43_s23 }
  0x25   :  { %p2033_p2 = scmp.ne.s32.totalorder %s43_s23, %s2032_s30  ;;  %p2038_p4 = scmp.lt.s32.totalorder %s2032_s30, %s2032_s30 }
  0x27   :  { %p2039_p5 = por %p2038_p4, %p2037_p3 }
  0x29   :  { %p2040_p6 = pnand %p2039_p5, %p2033_p2 }
  0x2b   :  { %2043 = shalt.err (!%p2040_p6)
}
  0x2c   :  { %s2101_s25 = smov 256   ;;  %s2102_s13 = smov 16  }
  0x2d   :  { %48 = dma.hbm_to_vmem [thread:$0]  %s2318_s4, 8192, %s43_s23, [#allocation3], %s2101_s25, %s2101_s25, %s2102_s13  }
  0x2e   :  { %s2103_s0 = smov [#allocation9]   ;;  %s2044_s19 = scalar_lea.hbm %s2322_s8, 2048 }
  0x2f   :  { %s70_s16 = sshll.u32 %s2103_s0, 4  ;;  %p2045_p7 = scmp.ne.s32.totalorder %s2322_s8, %s2044_s19  ;;  %s71_s16 = int_to_ptr.vmem [resolvable:$true] %s70_s16 }
  0x30   :  { %p2048_p8 = scmp.lt.u32.totalorder %s2044_s19, %s2322_s8 }
  0x32   :  { %p2050_p9 = pnand %p2048_p8, %p2045_p7 }
  0x34   :  { %2053 = shalt.err (!%p2050_p9)
}
  0x35   :  { %s2054_s27 = scalar_lea.vmem %s71_s16, 2048  ;;  %p2059_p11 = scmp.lt.s32.totalorder %s71_s16, %s71_s16 }
  0x36   :  { %p2055_p10 = scmp.ne.s32.totalorder %s71_s16, %s2054_s27  ;;  %p2060_p12 = scmp.lt.s32.totalorder %s2054_s27, %s2054_s27 }
  0x38   :  { %p2061_p13 = por %p2060_p12, %p2059_p11 }
  0x3a   :  { %p2062_p0 = pnand %p2061_p13, %p2055_p10 }
  0x3c   :  { %2065 = shalt.err (!%p2062_p0)
}
  0x3d   :  { %s2104_s4 = smov 64   ;;  %s2105_s23 = smov 4  }
  0x3e   :  { %76 = dma.hbm_to_vmem [thread:$0]  %s2322_s8, 2048, %s71_s16, [#allocation8], %s2104_s4, %s2104_s4, %s2105_s23  }
  0x3f   :  { %2088 = dma.done.wait [#allocation5], 16  }
  0x40   :  { %2089 = vsyncadd [#allocation5], 4294967280 }
  0x41   :  { %2090 = dma.done.wait [#allocation3], 8192  }
  0x42   :  { %2091 = vsyncadd [#allocation3], 4294959104 }
  0x43   :  { %2092 = dma.done.wait [#allocation8], 10240  }
  0x44   :  { %2093 = vsyncadd [#allocation8], 4294957056 }
  0x45   :  { %95 = sfence }
  0x46   :  { %v1758_v0 = vld [vmem:[%s2316_s2 + $0x4] ss:$8 sps:$4 sm:$0xff]   ;;  %v1760_v1 = vld [vmem:[%s2316_s2] ss:$8 sps:$4 sm:$0xff]   ;;  %v2106_v2 = vmov 0   ;;  %vm159_vm0 = vcmask 523264  }
  0x47   :  { %195 = vmatprep.mubr.bf16.mxu0 %v2106_v2  ;;  %163 = vmatprep.subr.bf16.mxu0 %v1758_v0  ;;  %v1761_v3 = vld [vmem:[%s2316_s2 + $0x14] ss:$8 sps:$4 sm:$0xff]   ;;  %v1763_v4 = vld [vmem:[%s2316_s2 + $0x10] ss:$8 sps:$4 sm:$0xff]   ;;  %v1764_v5 = vld [vmem:[%s2316_s2 + $0x24] ss:$8 sps:$4 sm:$0xff]  }
  0x48   :  { %164 = vmatpush1.bf16.msra.mxu0 %v1760_v1  ;;  %v1770_v6 = vld [vmem:[#allocation6 + $0x4] ss:$16 sps:$4 sm:$0xff]   ;;  %v1766_v7 = vld [vmem:[%s2316_s2 + $0x20] ss:$8 sps:$4 sm:$0xff]   ;;  %v1769_v11 = vld [vmem:[%s2316_s2 + $0x30] ss:$8 sps:$4 sm:$0xff]  }
  0x49   :  { %165 = vmatprep.subr.bf16.mxu0 %v1761_v3  ;;  %v1767_v8 = vld [vmem:[%s2316_s2 + $0x34] ss:$8 sps:$4 sm:$0xff]   ;;  %620 = vmatprep.subr.bf16.mxu1 %v1770_v6  ;;  %v1775_v9 = vld [vmem:[#allocation6] ss:$16 sps:$4 sm:$0xff]   ;;  %v1772_v18 = vld [vmem:[#allocation6 + $0x8] ss:$16 sps:$4 sm:$0xff]  }
  0x4a   :  { %v1776_v10 = vld [vmem:[#allocation6 + $0x24] ss:$16 sps:$4 sm:$0xff]   ;;  %621 = vmatpush1.bf16.msra.mxu1 %v1775_v9  ;;  %v1781_v13 = vld [vmem:[#allocation6 + $0x20] ss:$16 sps:$4 sm:$0xff]   ;;  %v1774_v15 = vld [vmem:[#allocation6 + $0xc] ss:$16 sps:$4 sm:$0xff]  }
  0x4b   :  { %v97_v12 = vld [vmem:[%s2315_s1] sm:$0xff]  ;;  %622 = vmatprep.subr.bf16.mxu1 %v1776_v10  ;;  %v1780_v20 = vld [vmem:[#allocation6 + $0x2c] ss:$16 sps:$4 sm:$0xff]   ;;  %v1778_v21 = vld [vmem:[#allocation6 + $0x28] ss:$16 sps:$4 sm:$0xff]   ;;  %s204_s1 = sld [smem:[#allocation2]] }
  0x4c   :  { %166 = vmatpush1.bf16.msra.mxu0 %v1763_v4  ;;  %v1782_v14 = vld [vmem:[#allocation6 + $0x44] ss:$16 sps:$4 sm:$0xff]   ;;  %v98_v16 = vpack.c.bf16 %v97_v12, %v97_v12  ;;  %v1787_v17 = vld [vmem:[#allocation6 + $0x40] ss:$16 sps:$4 sm:$0xff]   ;;  %v1786_v24 = vld [vmem:[#allocation6 + $0x4c] ss:$16 sps:$4 sm:$0xff]   ;;  %v109_v12 = vlaneseq }
  0x4d   :  { %167 = vmatprep.subr.bf16.mxu0 %v1764_v5  ;;  %v1788_v19 = vld [vmem:[#allocation6 + $0x64] ss:$16 sps:$4 sm:$0xff]   ;;  %v1793_v22 = vld [vmem:[#allocation6 + $0x60] ss:$16 sps:$4 sm:$0xff]   ;;  %v1784_v26 = vld [vmem:[#allocation6 + $0x48] ss:$16 sps:$4 sm:$0xff]  }
  0x4e   :  { %623 = vmatpush1.bf16.msra.mxu1 %v1781_v13  ;;  %v1794_v23 = vld [vmem:[#allocation6 + $0x84] ss:$16 sps:$4 sm:$0xff]   ;;  %v1799_v25 = vld [vmem:[#allocation6 + $0x80] ss:$16 sps:$4 sm:$0xff]   ;;  %v1792_v28 = vld [vmem:[#allocation6 + $0x6c] ss:$16 sps:$4 sm:$0xff]  }
  0x4f   :  { %624 = vmatprep.subr.bf16.mxu1 %v1782_v14  ;;  %v1800_v27 = vld [vmem:[#allocation6 + $0xa4] ss:$16 sps:$4 sm:$0xff]   ;;  %v1790_v29 = vld [vmem:[#allocation6 + $0x68] ss:$16 sps:$4 sm:$0xff]   ;;  %v1805_v30 = vld [vmem:[#allocation6 + $0xa0] ss:$16 sps:$4 sm:$0xff]  }
  0x50   :  { %168 = vmatpush1.bf16.msra.mxu0 %v1766_v7  ;;  %v1806_v31 = vld [vmem:[#allocation6 + $0xc4] ss:$16 sps:$4 sm:$0xff]   ;;  %v1798_v32 = vld [vmem:[#allocation6 + $0x8c] ss:$16 sps:$4 sm:$0xff]   ;;  %v1811_v33 = vld [vmem:[#allocation6 + $0xc0] ss:$16 sps:$4 sm:$0xff]  }
  0x51   :  { %169 = vmatprep.subr.bf16.mxu0 %v1767_v8  ;;  %v1796_v34 = vld [vmem:[#allocation6 + $0x88] ss:$16 sps:$4 sm:$0xff]   ;;  %v1812_v35 = vld [vmem:[#allocation6 + $0xe4] ss:$16 sps:$4 sm:$0xff]   ;;  %v1804_v36 = vld [vmem:[#allocation6 + $0xac] ss:$16 sps:$4 sm:$0xff]  }
  0x52   :  { %625 = vmatpush1.bf16.msra.mxu1 %v1787_v17  ;;  %v1802_v37 = vld [vmem:[#allocation6 + $0xa8] ss:$16 sps:$4 sm:$0xff]   ;;  %v1817_v38 = vld [vmem:[#allocation6 + $0xe0] ss:$16 sps:$4 sm:$0xff]   ;;  %v1818_v39 = vld [vmem:[#allocation6 + $0x104] ss:$16 sps:$4 sm:$0xff]  }
  0x53   :  { %626 = vmatprep.subr.bf16.mxu1 %v1788_v19  ;;  %v1810_v40 = vld [vmem:[#allocation6 + $0xcc] ss:$16 sps:$4 sm:$0xff]   ;;  %v1823_v41 = vld [vmem:[#allocation6 + $0x100] ss:$16 sps:$4 sm:$0xff]   ;;  %v1808_v42 = vld [vmem:[#allocation6 + $0xc8] ss:$16 sps:$4 sm:$0xff]  }
  0x54   :  { %170 = vmatpush1.bf16.msra.mxu0 %v1769_v11  ;;  %v1824_v43 = vld [vmem:[#allocation6 + $0x124] ss:$16 sps:$4 sm:$0xff]   ;;  %v1816_v44 = vld [vmem:[#allocation6 + $0xec] ss:$16 sps:$4 sm:$0xff]   ;;  %v1814_v45 = vld [vmem:[#allocation6 + $0xe8] ss:$16 sps:$4 sm:$0xff]  }
  0x55   :  { %661 = vmatprep.subr.bf16.mxu0 %v1774_v15  ;;  %v1822_v46 = vld [vmem:[#allocation6 + $0x10c] ss:$16 sps:$4 sm:$0xff]   ;;  %v1829_v47 = vld [vmem:[#allocation6 + $0x120] ss:$16 sps:$4 sm:$0xff]   ;;  %v1830_v48 = vld [vmem:[#allocation6 + $0x144] ss:$16 sps:$4 sm:$0xff]  }
  0x56   :  { %627 = vmatpush1.bf16.msra.mxu1 %v1793_v22  ;;  %v1835_v49 = vld [vmem:[#allocation6 + $0x140] ss:$16 sps:$4 sm:$0xff]   ;;  %v1820_v50 = vld [vmem:[#allocation6 + $0x108] ss:$16 sps:$4 sm:$0xff]   ;;  %v1836_v51 = vld [vmem:[#allocation6 + $0x164] ss:$16 sps:$4 sm:$0xff]  }
  0x57   :  { %1529 = vmatmul.mubr.msk.bf16.vlgmr.msra.gmra.mrb[0].mxu0 %vm159_vm0, %v98_v16  ;;  %628 = vmatprep.subr.bf16.mxu1 %v1794_v23  ;;  %v1828_v52 = vld [vmem:[#allocation6 + $0x12c] ss:$16 sps:$4 sm:$0xff]   ;;  %v1841_v53 = vld [vmem:[#allocation6 + $0x160] ss:$16 sps:$4 sm:$0xff]   ;;  %v1826_v54 = vld [vmem:[#allocation6 + $0x128] ss:$16 sps:$4 sm:$0xff]  }
  0x58   :  { %662 = vmatpush1.bf16.msra.mxu0 %v1772_v18  ;;  %v1842_v55 = vld [vmem:[#allocation6 + $0x184] ss:$16 sps:$4 sm:$0xff]   ;;  %v1834_v56 = vld [vmem:[#allocation6 + $0x14c] ss:$16 sps:$4 sm:$0xff]   ;;  %v1847_v57 = vld [vmem:[#allocation6 + $0x180] ss:$16 sps:$4 sm:$0xff]  }
  0x59   :  { %663 = vmatprep.subr.bf16.mxu0 %v1780_v20  ;;  %v1832_v58 = vld [vmem:[#allocation6 + $0x148] ss:$16 sps:$4 sm:$0xff]   ;;  %v1848_v59 = vld [vmem:[#allocation6 + $0x1a4] ss:$16 sps:$4 sm:$0xff]   ;;  %v1840_v60 = vld [vmem:[#allocation6 + $0x16c] ss:$16 sps:$4 sm:$0xff]   ;;  %v207_v20 = vstv %s204_s1 }
  0x5a   :  { %629 = vmatpush1.bf16.msra.mxu1 %v1799_v25  ;;  %v1853_v61 = vld [vmem:[#allocation6 + $0x1a0] ss:$16 sps:$4 sm:$0xff]   ;;  %v1838_v62 = vld [vmem:[#allocation6 + $0x168] ss:$16 sps:$4 sm:$0xff]   ;;  %v1846_v63 = vld [vmem:[#allocation6 + $0x18c] ss:$16 sps:$4 sm:$0xff]  }
  0x5b   :  { %630 = vmatprep.subr.bf16.mxu1 %v1800_v27  ;;  %v1844_v0 = vld [vmem:[#allocation6 + $0x188] ss:$16 sps:$4 sm:$0xff]   ;;  %v1852_v1 = vld [vmem:[#allocation6 + $0x1ac] ss:$16 sps:$4 sm:$0xff]   ;;  %v1854_v3 = vld [vmem:[#allocation6 + $0x1c4] ss:$16 sps:$4 sm:$0xff]  }
  0x5c   :  { %664 = vmatpush1.bf16.msra.mxu0 %v1778_v21  ;;  %v1850_v2 = vld [vmem:[#allocation6 + $0x1a8] ss:$16 sps:$4 sm:$0xff]   ;;  %v1858_v4 = vld [vmem:[#allocation6 + $0x1cc] ss:$16 sps:$4 sm:$0xff]   ;;  %v1859_v6 = vld [vmem:[#allocation6 + $0x1c0] ss:$16 sps:$4 sm:$0xff]  }
  0x5d   :  { %665 = vmatprep.subr.bf16.mxu0 %v1786_v24  ;;  %v1856_v5 = vld [vmem:[#allocation6 + $0x1c8] ss:$16 sps:$4 sm:$0xff]   ;;  %v1860_v7 = vld [vmem:[#allocation6 + $0x1e4] ss:$16 sps:$4 sm:$0xff]   ;;  %v1864_v9 = vld [vmem:[#allocation6 + $0x1ec] ss:$16 sps:$4 sm:$0xff]  }
  0x5e   :  { %631 = vmatpush1.bf16.msra.mxu1 %v1805_v30  ;;  %v1862_v8 = vld [vmem:[#allocation6 + $0x1e8] ss:$16 sps:$4 sm:$0xff]   ;;  %v1865_v10 = vld [vmem:[#allocation6 + $0x1e0] ss:$16 sps:$4 sm:$0xff]   ;;  %v1868_v11 = vld [vmem:[#allocation7 + $0x4] ss:$8 sps:$4 sm:$0xff]  }
  0x5f   :  { %632 = vmatprep.subr.bf16.mxu1 %v1806_v31  ;;  %v2242_v13 = vshrl.u32 %v109_v12, 7  ;;  %v107_v15 = vld [vmem:[%s2317_s3] sm:$0x3]  ;;  %s1594_s3 = sld [smem:[#allocation2 + $0x1]]  ;;  %vm2108_vm9 = vmmov 0   ;;  %s1677_s26 = sld [smem:[#allocation2 + $0x3]] }
  0x60   :  { %666 = vmatpush1.bf16.msra.mxu0 %v1784_v26  ;;  %v1866_v31 = vld [vmem:[#allocation7] ss:$8 sps:$4 sm:$0xff]  }
  0x61   :  { %667 = vmatprep.subr.bf16.mxu0 %v1792_v28  ;;  %v2245_v14 = vsub.s32 0, %v2242_v13  ;;  %v2251_v16 = vsub.s32 1, %v2242_v13  ;;  %v290_v12 = vsub.s32 2, %v2242_v13 }
  0x62   :  { %633 = vmatpush1.bf16.msra.mxu1 %v1811_v33  ;;  %v1871_v33 = vld [vmem:[#allocation7 + $0x14] ss:$8 sps:$4 sm:$0xff]  }
  0x63   :  { %634 = vmatprep.subr.bf16.mxu1 %v1812_v35  ;;  %v112_v17 = vrot.slane %v107_v15, %v2245_v14  ;;  %v116_v18 = vrot.slane %v107_v15, %v2251_v16  ;;  %v1874_v35 = vld [vmem:[#allocation7 + $0x24] ss:$8 sps:$4 sm:$0xff]   ;;  %v278_v15 = vld [vmem:[%s2319_s5] sm:$0xf]  ;;  %s1659_s5 = sld [smem:[#allocation2 + $0x2]] }
  0x64   :  { %668 = vmatpush1.bf16.msra.mxu0 %v1790_v29 }
  0x65   :  { %669 = vmatprep.subr.bf16.mxu0 %v1798_v32 }
  0x66   :  { %635 = vmatpush1.bf16.msra.mxu1 %v1817_v38  ;;  %v1875_v38 = vld [vmem:[#allocation7 + $0x30] ss:$8 sps:$4 sm:$0xff]  }
  0x67   :  { %636 = vmatprep.subr.bf16.mxu1 %v1818_v39  ;;  %v1880_v39 = vld [vmem:[#allocation7 + $0x44] ss:$8 sps:$4 sm:$0xff]  }
  0x68   :  { %670 = vmatpush1.bf16.msra.mxu0 %v1796_v34  ;;  %v1869_v34 = vld [vmem:[#allocation7 + $0x10] ss:$8 sps:$4 sm:$0xff]  }
  0x69   :  { %671 = vmatprep.subr.bf16.mxu0 %v1804_v36  ;;  %v1872_v36 = vld [vmem:[#allocation7 + $0x20] ss:$8 sps:$4 sm:$0xff]  }
  0x6a   :  { %637 = vmatpush1.bf16.msra.mxu1 %v1823_v41  ;;  %v1883_v41 = vld [vmem:[#allocation7 + $0x54] ss:$8 sps:$4 sm:$0xff]  }
  0x6b   :  { %638 = vmatprep.subr.bf16.mxu1 %v1824_v43  ;;  %v1886_v43 = vld [vmem:[#allocation7 + $0x64] ss:$8 sps:$4 sm:$0xff]  }
  0x6c   :  { %672 = vmatpush1.bf16.msra.mxu0 %v1802_v37  ;;  %v1877_v37 = vld [vmem:[#allocation7 + $0x34] ss:$8 sps:$4 sm:$0xff]  }
  0x6d   :  { %673 = vmatprep.subr.bf16.mxu0 %v1810_v40  ;;  %v1878_v40 = vld [vmem:[#allocation7 + $0x40] ss:$8 sps:$4 sm:$0xff]  }
  0x6e   :  { %639 = vmatpush1.bf16.msra.mxu1 %v1829_v47  ;;  %v1892_v47 = vld [vmem:[#allocation7 + $0x84] ss:$8 sps:$4 sm:$0xff]  }
  0x6f   :  { %640 = vmatprep.subr.bf16.mxu1 %v1830_v48  ;;  %v1890_v48 = vld [vmem:[#allocation7 + $0x80] ss:$8 sps:$4 sm:$0xff]  }
  0x70   :  { %674 = vmatpush1.bf16.msra.mxu0 %v1808_v42  ;;  %v1881_v42 = vld [vmem:[#allocation7 + $0x50] ss:$8 sps:$4 sm:$0xff]  }
  0x71   :  { %675 = vmatprep.subr.bf16.mxu0 %v1816_v44  ;;  %v1884_v44 = vld [vmem:[#allocation7 + $0x60] ss:$8 sps:$4 sm:$0xff]  }
  0x72   :  { %641 = vmatpush1.bf16.msra.mxu1 %v1835_v49  ;;  %v1895_v49 = vld [vmem:[#allocation7 + $0x94] ss:$8 sps:$4 sm:$0xff]  }
  0x73   :  { %642 = vmatprep.subr.bf16.mxu1 %v1836_v51  ;;  %v1898_v51 = vld [vmem:[#allocation7 + $0xa4] ss:$8 sps:$4 sm:$0xff]  }
  0x74   :  { %676 = vmatpush1.bf16.msra.mxu0 %v1814_v45  ;;  %v1889_v45 = vld [vmem:[#allocation7 + $0x74] ss:$8 sps:$4 sm:$0xff]  }
  0x75   :  { %677 = vmatprep.subr.bf16.mxu0 %v1822_v46  ;;  %v1887_v46 = vld [vmem:[#allocation7 + $0x70] ss:$8 sps:$4 sm:$0xff]  }
  0x76   :  { %643 = vmatpush1.bf16.msra.mxu1 %v1841_v53  ;;  %v1901_v53 = vld [vmem:[#allocation7 + $0xb4] ss:$8 sps:$4 sm:$0xff]  }
  0x77   :  { %644 = vmatprep.subr.bf16.mxu1 %v1842_v55  ;;  %v1904_v55 = vld [vmem:[#allocation7 + $0xc4] ss:$8 sps:$4 sm:$0xff]  }
  0x78   :  { %678 = vmatpush1.bf16.msra.mxu0 %v1820_v50  ;;  %v1893_v50 = vld [vmem:[#allocation7 + $0x90] ss:$8 sps:$4 sm:$0xff]  }
  0x79   :  { %679 = vmatprep.subr.bf16.mxu0 %v1828_v52  ;;  %v1896_v52 = vld [vmem:[#allocation7 + $0xa0] ss:$8 sps:$4 sm:$0xff]  }
  0x7a   :  { %645 = vmatpush1.bf16.msra.mxu1 %v1847_v57  ;;  %v1907_v57 = vld [vmem:[#allocation7 + $0xd4] ss:$8 sps:$4 sm:$0xff]  }
  0x7b   :  { %646 = vmatprep.subr.bf16.mxu1 %v1848_v59  ;;  %v1910_v59 = vld [vmem:[#allocation7 + $0xe4] ss:$8 sps:$4 sm:$0xff]  }
  0x7c   :  { %680 = vmatpush1.bf16.msra.mxu0 %v1826_v54  ;;  %v1899_v54 = vld [vmem:[#allocation7 + $0xb0] ss:$8 sps:$4 sm:$0xff]  }
  0x7d   :  { %681 = vmatprep.subr.bf16.mxu0 %v1834_v56  ;;  %v1902_v56 = vld [vmem:[#allocation7 + $0xc0] ss:$8 sps:$4 sm:$0xff]  }
  0x7e   :  { %647 = vmatpush1.bf16.msra.mxu1 %v1853_v61  ;;  %v1913_v61 = vld [vmem:[#allocation7 + $0xf4] ss:$8 sps:$4 sm:$0xff]  }
  0x7f   :  { %648 = vmatprep.subr.bf16.mxu1 %v1854_v3  ;;  %v1965_v3 = vld [vmem:[#allocation9 + $0x8] sm:$0xff]  }
  0x80   :  { %682 = vmatpush1.bf16.msra.mxu0 %v1832_v58  ;;  %v1905_v58 = vld [vmem:[#allocation7 + $0xd0] ss:$8 sps:$4 sm:$0xff]  }
  0x81   :  { %683 = vmatprep.subr.bf16.mxu0 %v1840_v60  ;;  %v1908_v60 = vld [vmem:[#allocation7 + $0xe0] ss:$8 sps:$4 sm:$0xff]  }
  0x82   :  { %649 = vmatpush1.bf16.msra.mxu1 %v1859_v6  ;;  %v1968_v6 = vld [vmem:[#allocation9 + $0x58] sm:$0xff]  }
  0x83   :  { %650 = vmatprep.subr.bf16.mxu1 %v1860_v7  ;;  %v1969_v7 = vld [vmem:[#allocation9 + $0x18] sm:$0xff]  }
  0x84   :  { %684 = vmatpush1.bf16.msra.mxu0 %v1838_v62  ;;  %v1911_v62 = vld [vmem:[#allocation7 + $0xf0] ss:$8 sps:$4 sm:$0xff]  }
  0x85   :  { %685 = vmatprep.subr.bf16.mxu0 %v1846_v63  ;;  %v1916_v63 = vld [vmem:[#allocation7 + $0x104] ss:$8 sps:$4 sm:$0xff]  }
  0x86   :  { %651 = vmatpush1.bf16.msra.mxu1 %v1865_v10  ;;  %v1972_v10 = vld [vmem:[#allocation9 + $0x68] sm:$0xff]  }
  0x87   :  { %1116 = vmatprep.subr.bf16.mxu1 %v1868_v11  ;;  %v1973_v11 = vld [vmem:[#allocation9 + $0x28] sm:$0xff]  }
  0x88   :  { %686 = vmatpush1.bf16.msra.mxu0 %v1844_v0  ;;  %v1962_v0 = vld [vmem:[#allocation9 + $0x40] sm:$0xff]  }
  0x89   :  { %687 = vmatprep.subr.bf16.mxu0 %v1852_v1  ;;  %v1963_v1 = vld [vmem:[#allocation9] sm:$0xff]  }
  0x8c   :  { %688 = vmatpush1.bf16.msra.mxu0 %v1850_v2  ;;  %v1964_v2 = vld [vmem:[#allocation9 + $0x48] sm:$0xff]  }
  0x8d   :  { %689 = vmatprep.subr.bf16.mxu0 %v1858_v4  ;;  %v1966_v4 = vld [vmem:[#allocation9 + $0x50] sm:$0xff]  }
  0x90   :  { %690 = vmatpush1.bf16.msra.mxu0 %v1856_v5  ;;  %v1967_v5 = vld [vmem:[#allocation9 + $0x10] sm:$0xff]  }
  0x91   :  { %691 = vmatprep.subr.bf16.mxu0 %v1864_v9  ;;  %v1971_v9 = vld [vmem:[#allocation9 + $0x20] sm:$0xff]  }
  0x94   :  { %692 = vmatpush1.bf16.msra.mxu0 %v1862_v8  ;;  %v1970_v8 = vld [vmem:[#allocation9 + $0x60] sm:$0xff]  }
  0x95   :  { %1687 = vmatprep.subr.bf16.mxu0 %v1962_v0  ;;  %v1946_v0 = vld [vmem:[#allocation7 + $0x1a4] ss:$8 sps:$4 sm:$0xff]  }
 0x12a   :  { %v197_v19 = vpop.f32.mrb[0].mxu0 }
 0x12b   :  { %v198_v21 = vadd.f32 %v197_v19, %v112_v17  ;;  %v199_v22 = vpop.f32.mrb[1].mxu0  ;;  %v294_v17 = vsub.s32 3, %v2242_v13  ;;  %v291_v19 = vrot.slane %v278_v15, %v290_v12 }
 0x12c   :  { %v200_v23 = vadd.f32 %v199_v22, %v116_v18  ;;  %v201_v24 = vpop.f32.mrb[2].mxu0  ;;  %v283_v18 = vrot.slane %v278_v15, %v2245_v14 }
 0x12d   :  { %vm205_vm1 = vcmp.ge.f32.partialorder %v198_v21, 0.0  ;;  %v208_v25 = vmul.f32 %v207_v20, %v198_v21  ;;  %v202_v26 = vpop.f32.mrb[3].mxu0 }
 0x12e   :  { %v209_v27 = vmul.f32 %v207_v20, %v200_v23  ;;  %vm206_vm2 = vcmp.ge.f32.partialorder %v200_v23, 0.0  ;;  %v287_v20 = vrot.slane %v278_v15, %v2251_v16 }
 0x12f   :  { %v210_v28 = vsel %vm205_vm1, %v198_v21, %v208_v25  ;;  %v295_v21 = vrot.slane %v278_v15, %v294_v17  ;;  %v1974_v15 = vld [vmem:[#allocation9 + $0x70] sm:$0xff]  }
 0x130   :  { %v211_v29 = vsel %vm206_vm2, %v200_v23, %v209_v27  ;;  %v212_v32 = vpack.c.bf16 %v210_v28, %v210_v28  ;;  %v707_v23 = vstv %s1594_s3  ;;  %v1975_v17 = vld [vmem:[#allocation9 + $0x30] sm:$0xff]  }
 0x131   :  { %v213_v30 = vpack.c.bf16 %v211_v29, %v211_v29 }
 0x133   :  { %652 = vmatprep.mubr.bf16.mxu1 %v213_v30  ;;  %693 = vmatprep.mubr.bf16.mxu0 %v213_v30 }
 0x134   :  { %653 = vmatmul.mubr.bf16.vlgmr.msra.gmra.mrb[0].mxu1 %v212_v32  ;;  %694 = vmatmul.mubr.bf16.vlgmr.msra.gmra.mrb[4].mxu0 %v212_v32 }
 0x135   :  { %1117 = vmatpush1.bf16.msra.mxu1 %v1866_v31  ;;  %1688 = vmatpush3.bf16.msra.mxu0 %v1963_v1  ;;  %v1944_v1 = vld [vmem:[#allocation7 + $0x1a0] ss:$8 sps:$4 sm:$0xff]  }
 0x136   :  { %1118 = vmatprep.subr.bf16.mxu1 %v1871_v33  ;;  %1689 = vmatprep.subr.bf16.mxu0 %v1964_v2  ;;  %v1949_v2 = vld [vmem:[#allocation7 + $0x1b4] ss:$8 sps:$4 sm:$0xff]  }
 0x139   :  { %1119 = vmatpush1.bf16.msra.mxu1 %v1869_v34  ;;  %1690 = vmatpush3.bf16.msra.mxu0 %v1965_v3  ;;  %v1947_v3 = vld [vmem:[#allocation7 + $0x1b0] ss:$8 sps:$4 sm:$0xff]  }
 0x13a   :  { %1120 = vmatprep.subr.bf16.mxu1 %v1874_v35  ;;  %1691 = vmatprep.subr.bf16.mxu0 %v1966_v4  ;;  %v1952_v4 = vld [vmem:[#allocation7 + $0x1c4] ss:$8 sps:$4 sm:$0xff]  }
 0x13d   :  { %1121 = vmatpush1.bf16.msra.mxu1 %v1872_v36  ;;  %1692 = vmatpush3.bf16.msra.mxu0 %v1967_v5  ;;  %v1950_v5 = vld [vmem:[#allocation7 + $0x1c0] ss:$8 sps:$4 sm:$0xff]  }
 0x13e   :  { %1122 = vmatprep.subr.bf16.mxu1 %v1877_v37  ;;  %1693 = vmatprep.subr.bf16.mxu0 %v1968_v6  ;;  %v1955_v6 = vld [vmem:[#allocation7 + $0x1d4] ss:$8 sps:$4 sm:$0xff]  }
 0x141   :  { %1123 = vmatpush1.bf16.msra.mxu1 %v1875_v38  ;;  %1694 = vmatpush3.bf16.msra.mxu0 %v1969_v7  ;;  %v1953_v7 = vld [vmem:[#allocation7 + $0x1d0] ss:$8 sps:$4 sm:$0xff]  }
 0x142   :  { %1124 = vmatprep.subr.bf16.mxu1 %v1880_v39  ;;  %1695 = vmatprep.subr.bf16.mxu0 %v1970_v8  ;;  %v1958_v8 = vld [vmem:[#allocation7 + $0x1e4] ss:$8 sps:$4 sm:$0xff]  }
 0x145   :  { %1125 = vmatpush1.bf16.msra.mxu1 %v1878_v40  ;;  %1696 = vmatpush3.bf16.msra.mxu0 %v1971_v9  ;;  %v1956_v9 = vld [vmem:[#allocation7 + $0x1e0] ss:$8 sps:$4 sm:$0xff]  }
 0x146   :  { %1126 = vmatprep.subr.bf16.mxu1 %v1883_v41  ;;  %1697 = vmatprep.subr.bf16.mxu0 %v1972_v10  ;;  %v1961_v10 = vld [vmem:[#allocation7 + $0x1f4] ss:$8 sps:$4 sm:$0xff]  }
 0x149   :  { %1127 = vmatpush1.bf16.msra.mxu1 %v1881_v42  ;;  %1698 = vmatpush3.bf16.msra.mxu0 %v1973_v11  ;;  %v1959_v11 = vld [vmem:[#allocation7 + $0x1f0] ss:$8 sps:$4 sm:$0xff]  }
 0x14a   :  { %1128 = vmatprep.subr.bf16.mxu1 %v1886_v43  ;;  %v1914_v43 = vld [vmem:[#allocation7 + $0x100] ss:$8 sps:$4 sm:$0xff]   ;;  %1699 = vmatprep.subr.bf16.mxu0 %v1974_v15 }
 0x14d   :  { %1129 = vmatpush1.bf16.msra.mxu1 %v1884_v44  ;;  %1700 = vmatpush3.bf16.msra.mxu0 %v1975_v17 }
 0x14e   :  { %1130 = vmatprep.subr.bf16.mxu1 %v1889_v45  ;;  %v1919_v45 = vld [vmem:[#allocation7 + $0x114] ss:$8 sps:$4 sm:$0xff]  }
 0x151   :  { %1131 = vmatpush1.bf16.msra.mxu1 %v1887_v46 }
 0x152   :  { %1132 = vmatprep.subr.bf16.mxu1 %v1892_v47  ;;  %v1917_v47 = vld [vmem:[#allocation7 + $0x110] ss:$8 sps:$4 sm:$0xff]  }
 0x155   :  { %1133 = vmatpush1.bf16.msra.mxu1 %v1890_v48  ;;  %v1922_v48 = vld [vmem:[#allocation7 + $0x124] ss:$8 sps:$4 sm:$0xff]  }
 0x156   :  { %1134 = vmatprep.subr.bf16.mxu1 %v1895_v49  ;;  %v1920_v49 = vld [vmem:[#allocation7 + $0x120] ss:$8 sps:$4 sm:$0xff]  }
 0x159   :  { %1135 = vmatpush1.bf16.msra.mxu1 %v1893_v50  ;;  %v1925_v50 = vld [vmem:[#allocation7 + $0x134] ss:$8 sps:$4 sm:$0xff]  }
 0x15a   :  { %1136 = vmatprep.subr.bf16.mxu1 %v1898_v51  ;;  %v1923_v51 = vld [vmem:[#allocation7 + $0x130] ss:$8 sps:$4 sm:$0xff]  }
 0x15d   :  { %1137 = vmatpush1.bf16.msra.mxu1 %v1896_v52  ;;  %v1928_v52 = vld [vmem:[#allocation7 + $0x144] ss:$8 sps:$4 sm:$0xff]  }
 0x15e   :  { %1138 = vmatprep.subr.bf16.mxu1 %v1901_v53  ;;  %v1926_v53 = vld [vmem:[#allocation7 + $0x140] ss:$8 sps:$4 sm:$0xff]  }
 0x161   :  { %1139 = vmatpush1.bf16.msra.mxu1 %v1899_v54  ;;  %v1931_v54 = vld [vmem:[#allocation7 + $0x154] ss:$8 sps:$4 sm:$0xff]  }
 0x162   :  { %1140 = vmatprep.subr.bf16.mxu1 %v1904_v55  ;;  %v1929_v55 = vld [vmem:[#allocation7 + $0x150] ss:$8 sps:$4 sm:$0xff]  }
 0x165   :  { %1141 = vmatpush1.bf16.msra.mxu1 %v1902_v56  ;;  %v1934_v56 = vld [vmem:[#allocation7 + $0x164] ss:$8 sps:$4 sm:$0xff]  }
 0x166   :  { %1142 = vmatprep.subr.bf16.mxu1 %v1907_v57  ;;  %v1932_v57 = vld [vmem:[#allocation7 + $0x160] ss:$8 sps:$4 sm:$0xff]  }
 0x169   :  { %1143 = vmatpush1.bf16.msra.mxu1 %v1905_v58  ;;  %v1937_v58 = vld [vmem:[#allocation7 + $0x174] ss:$8 sps:$4 sm:$0xff]  }
 0x16a   :  { %1144 = vmatprep.subr.bf16.mxu1 %v1910_v59  ;;  %v1935_v59 = vld [vmem:[#allocation7 + $0x170] ss:$8 sps:$4 sm:$0xff]  }
 0x16d   :  { %1145 = vmatpush1.bf16.msra.mxu1 %v1908_v60  ;;  %v1940_v60 = vld [vmem:[#allocation7 + $0x184] ss:$8 sps:$4 sm:$0xff]  }
 0x16e   :  { %1146 = vmatprep.subr.bf16.mxu1 %v1913_v61  ;;  %v1938_v61 = vld [vmem:[#allocation7 + $0x180] ss:$8 sps:$4 sm:$0xff]  }
 0x171   :  { %1147 = vmatpush1.bf16.msra.mxu1 %v1911_v62  ;;  %v1943_v62 = vld [vmem:[#allocation7 + $0x194] ss:$8 sps:$4 sm:$0xff]  }
 0x172   :  { %1157 = vmatprep.subr.bf16.mxu1 %v1916_v63  ;;  %v1941_v63 = vld [vmem:[#allocation7 + $0x190] ss:$8 sps:$4 sm:$0xff]  }
 0x207   :  { %v654_v22 = vpop.f32.mrb[0].mxu1  ;;  %v695_v24 = vpop.f32.mrb[4].mxu0 }
 0x208   :  { %v655_v25 = vadd.f32 %v654_v22, %v283_v18  ;;  %v696_v26 = vadd.f32 %v695_v24, %v291_v19  ;;  %v656_v27 = vpop.f32.mrb[1].mxu1  ;;  %v697_v28 = vpop.f32.mrb[5].mxu0  ;;  %v1976_v18 = vld [vmem:[#allocation9 + $0x78] sm:$0xff]  }
 0x209   :  { %v657_v29 = vadd.f32 %v656_v27, %v287_v20  ;;  %v698_v30 = vadd.f32 %v697_v28, %v295_v21  ;;  %v658_v31 = vpop.f32.mrb[2].mxu1  ;;  %v699_v32 = vpop.f32.mrb[6].mxu0  ;;  %v1977_v19 = vld [vmem:[#allocation9 + $0x38] sm:$0xff]   ;;  %1701 = vmatprep.subr.bf16.mxu0 %v1976_v18  ;;  %v2107_v20 = vmov 0.0   ;;  %v784_v21 = vld [vmem:[%s2321_s7] sm:$0x3] }
 0x20a   :  { %vm703_vm3 = vcmp.ge.f32.partialorder %v655_v25, 0.0  ;;  %v708_v33 = vmul.f32 %v707_v23, %v655_v25  ;;  %vm705_vm4 = vcmp.ge.f32.partialorder %v696_v26, 0.0  ;;  %v710_v13 = vmul.f32 %v707_v23, %v696_v26  ;;  %v659_v34 = vpop.f32.mrb[3].mxu1  ;;  %v700_v35 = vpop.f32.mrb[7].mxu0  ;;  %1702 = vmatpush3.bf16.msra.mxu0 %v1977_v19 }
 0x20b   :  { %vm704_vm5 = vcmp.ge.f32.partialorder %v657_v29, 0.0  ;;  %v709_v36 = vmul.f32 %v707_v23, %v657_v29  ;;  %vm706_vm6 = vcmp.ge.f32.partialorder %v698_v30, 0.0  ;;  %v711_v37 = vmul.f32 %v707_v23, %v698_v30  ;;  %1718 = vmatprep.subr.bf16.mxu0 %v2107_v20 }
 0x20c   :  { %v712_v38 = vsel %vm703_vm3, %v655_v25, %v708_v33  ;;  %v2262_v39 = vsel %vm705_vm4, %v696_v26, %v710_v13  ;;  %v789_v22 = vrot.slane %v784_v21, %v2245_v14  ;;  %v793_v23 = vrot.slane %v784_v21, %v2251_v16  ;;  %v1978_v14 = vld [vmem:[%s2324_s10] sm:$0xff]   ;;  %v1979_v16 = vld [vmem:[%s2324_s10 + $0x8] sm:$0xff]  }
 0x20d   :  { %v713_v40 = vsel %vm704_vm5, %v657_v29, %v709_v36  ;;  %v715_v41 = vsel %vm706_vm6, %v698_v30, %v711_v37  ;;  %v716_v44 = vpack.c.bf16 %v712_v38, %v712_v38  ;;  %v718_v12 = vpack.c.bf16 %v2262_v39, %v2262_v39  ;;  %v1980_v36 = vld [vmem:[%s2324_s10 + $0x10] sm:$0xff]   ;;  %v1981_v37 = vld [vmem:[%s2324_s10 + $0x18] sm:$0xff]   ;;  %v1982_v38 = vld [vmem:[%s2324_s10 + $0x20] sm:$0xff]  }
 0x20e   :  { %v717_v42 = vpack.c.bf16 %v713_v40, %v713_v40  ;;  %v719_v46 = vpack.c.bf16 %v715_v41, %v715_v41  ;;  %v1201_v25 = vstv %s1659_s5  ;;  %v1983_v39 = vld [vmem:[%s2324_s10 + $0x28] sm:$0xff]   ;;  %v1984_v40 = vld [vmem:[%s2324_s10 + $0x30] sm:$0xff]   ;;  %v1985_v41 = vld [vmem:[%s2324_s10 + $0x38] sm:$0xff]  }
 0x210   :  { %1148 = vmatprep.mubr.bf16.mxu1 %v717_v42 }
 0x211   :  { %1149 = vmatmul.mubr.bf16.vlgmr.msra.gmra.mrb[4].mxu1 %v716_v44 }
 0x212   :  { %1158 = vmatpush1.bf16.msra.mxu1 %v1914_v43  ;;  %1189 = vmatprep.mubr.bf16.mxu1 %v719_v46  ;;  %v1660_v43 = vld [vmem:[%s2323_s9] ss:$0 sm:$0xff]  ;;  %s2109_s9 = smov [#allocation10]  }
 0x213   :  { %1159 = vmatprep.subr.bf16.mxu1 %v1919_v45  ;;  %s1510_s4 = sshll.u32 %s2109_s9, 4  ;;  %s1511_s4 = int_to_ptr.vmem [resolvable:$true] %s1510_s4 }
 0x214   :  { %s2066_s3 = scalar_lea.vmem %s1511_s4, 128  ;;  %p2071_p2 = scmp.lt.s32.totalorder %s1511_s4, %s1511_s4 }
 0x215   :  { %p2067_p1 = scmp.ne.s32.totalorder %s1511_s4, %s2066_s3  ;;  %p2072_p3 = scmp.lt.s32.totalorder %s2066_s3, %s2066_s3 }
 0x216   :  { %1160 = vmatpush1.bf16.msra.mxu1 %v1917_v47  ;;  %v1385_v47 = vstv %s1677_s26 }
 0x217   :  { %1161 = vmatprep.subr.bf16.mxu1 %v1922_v48  ;;  %p2073_p4 = por %p2072_p3, %p2071_p2 }
 0x219   :  { %p2074_p5 = pnand %p2073_p4, %p2067_p1 }
 0x21a   :  { %1162 = vmatpush1.bf16.msra.mxu1 %v1920_v49 }
 0x21b   :  { %1163 = vmatprep.subr.bf16.mxu1 %v1925_v50 }
 0x21e   :  { %1164 = vmatpush1.bf16.msra.mxu1 %v1923_v51 }
 0x21f   :  { %1165 = vmatprep.subr.bf16.mxu1 %v1928_v52 }
 0x222   :  { %1166 = vmatpush1.bf16.msra.mxu1 %v1926_v53  ;;  %v1678_v53 = vld [vmem:[%s2325_s11] ss:$0 sm:$0xff] }
 0x223   :  { %1167 = vmatprep.subr.bf16.mxu1 %v1931_v54 }
 0x226   :  { %1168 = vmatpush1.bf16.msra.mxu1 %v1929_v55 }
 0x227   :  { %1169 = vmatprep.subr.bf16.mxu1 %v1934_v56 }
 0x22a   :  { %1170 = vmatpush1.bf16.msra.mxu1 %v1932_v57 }
 0x22b   :  { %1171 = vmatprep.subr.bf16.mxu1 %v1937_v58 }
 0x22e   :  { %1172 = vmatpush1.bf16.msra.mxu1 %v1935_v59 }
 0x22f   :  { %1173 = vmatprep.subr.bf16.mxu1 %v1940_v60 }
 0x232   :  { %1174 = vmatpush1.bf16.msra.mxu1 %v1938_v61 }
 0x233   :  { %1175 = vmatprep.subr.bf16.mxu1 %v1943_v62 }
 0x236   :  { %1176 = vmatpush1.bf16.msra.mxu1 %v1941_v63 }
 0x237   :  { %1177 = vmatprep.subr.bf16.mxu1 %v1946_v0 }
 0x23a   :  { %1178 = vmatpush1.bf16.msra.mxu1 %v1944_v1 }
 0x23b   :  { %1179 = vmatprep.subr.bf16.mxu1 %v1949_v2 }
 0x23e   :  { %1180 = vmatpush1.bf16.msra.mxu1 %v1947_v3 }
 0x23f   :  { %1181 = vmatprep.subr.bf16.mxu1 %v1952_v4 }
 0x242   :  { %1182 = vmatpush1.bf16.msra.mxu1 %v1950_v5 }
 0x243   :  { %1183 = vmatprep.subr.bf16.mxu1 %v1955_v6 }
 0x246   :  { %1184 = vmatpush1.bf16.msra.mxu1 %v1953_v7 }
 0x247   :  { %1185 = vmatprep.subr.bf16.mxu1 %v1958_v8 }
 0x24a   :  { %1186 = vmatpush1.bf16.msra.mxu1 %v1956_v9 }
 0x24b   :  { %1187 = vmatprep.subr.bf16.mxu1 %v1961_v10 }
 0x24e   :  { %1188 = vmatpush1.bf16.msra.mxu1 %v1959_v11 }
 0x251   :  { %1190 = vmatmul.mubr.bf16.vlgmr.msra.gmra.mrb[4].mxu1 %v718_v12 }
 0x324   :  { %v1191_v24 = vpop.f32.mrb[4].mxu1 }
 0x325   :  { %v1738_v26 = vadd.f32 %v1191_v24, %v789_v22  ;;  %v1193_v27 = vpop.f32.mrb[5].mxu1 }
 0x326   :  { %v1739_v28 = vadd.f32 %v1193_v27, %v793_v23  ;;  %v1195_v29 = vpop.f32.mrb[6].mxu1 }
 0x327   :  { %vm1199_vm7 = vcmp.ge.f32.partialorder %v1738_v26, 0.0  ;;  %v1202_v30 = vmul.f32 %v1738_v26, %v1201_v25  ;;  %v1196_v31 = vpop.f32.mrb[7].mxu1 }
 0x328   :  { %vm1200_vm8 = vcmp.ge.f32.partialorder %v1739_v28, 0.0  ;;  %v1203_v32 = vmul.f32 %v1739_v28, %v1201_v25 }
 0x329   :  { %v1204_v33 = vsel %vm1199_vm7, %v1738_v26, %v1202_v30 }
 0x32a   :  { %v1205_v13 = vsel %vm1200_vm8, %v1739_v28, %v1203_v32  ;;  %v1206_v35 = vpack.c.bf16 %v1204_v33, %v1204_v33 }
 0x32b   :  { %v1207_v34 = vpack.c.bf16 %v1205_v13, %v1205_v13 }
 0x32d   :  { %1375 = vmatprep.mubr.bf16.mxu0 %v1207_v34 }
 0x32e   :  { %1376 = vmatmul.mubr.bf16.vlgmr.msra.gmra.mrb[8].mxu0 %v1206_v35 }
 0x32f   :  { %1719 = vmatpush3.bf16.msra.mxu0 %v1978_v14  ;;  %1734 = vmatprep.mubr.msk.bf16.mxu0 %vm2108_vm9, %v2107_v20 }
 0x330   :  { %1720 = vmatprep.subr.bf16.mxu0 %v2107_v20 }
 0x333   :  { %1721 = vmatpush3.bf16.msra.mxu0 %v1979_v16 }
 0x334   :  { %1722 = vmatprep.subr.bf16.mxu0 %v2107_v20 }
 0x337   :  { %1723 = vmatpush3.bf16.msra.mxu0 %v1980_v36 }
 0x338   :  { %1724 = vmatprep.subr.bf16.mxu0 %v2107_v20 }
 0x33b   :  { %1725 = vmatpush3.bf16.msra.mxu0 %v1981_v37 }
 0x33c   :  { %1726 = vmatprep.subr.bf16.mxu0 %v2107_v20 }
 0x33f   :  { %1727 = vmatpush3.bf16.msra.mxu0 %v1982_v38 }
 0x340   :  { %1728 = vmatprep.subr.bf16.mxu0 %v2107_v20 }
 0x343   :  { %1729 = vmatpush3.bf16.msra.mxu0 %v1983_v39 }
 0x344   :  { %1730 = vmatprep.subr.bf16.mxu0 %v2107_v20 }
 0x347   :  { %1731 = vmatpush3.bf16.msra.mxu0 %v1984_v40 }
 0x348   :  { %1732 = vmatprep.subr.bf16.mxu0 %v2107_v20 }
 0x34b   :  { %1733 = vmatpush3.bf16.msra.mxu0 %v1985_v41 }
 0x401   :  { %v1703_v42 = vpop.f32.mrb[8].mxu0 }
 0x402   :  { %v1704_v44 = vpop.f32.mrb[9].mxu0 }
 0x403   :  { %v1705_v45 = vadd.f32 %v1704_v44, %v1703_v42  ;;  %v1706_v46 = vpop.f32.mrb[10].mxu0 }
 0x404   :  { %v1707_v48 = vpop.f32.mrb[11].mxu0 }
 0x405   :  { %v1378_v49 = vadd.f32 %v1705_v45, %v1660_v43 }
 0x407   :  { %vm1384_vm10 = vcmp.ge.f32.partialorder %v1378_v49, 0.0  ;;  %v1386_v50 = vmul.f32 %v1385_v47, %v1378_v49 }
 0x409   :  { %v1387_v51 = vsel %vm1384_vm10, %v1378_v49, %v1386_v50 }
 0x40a   :  { %v1388_v52 = vpack.c.bf16 %v1387_v51, %v1387_v51 }
 0x40c   :  { %1735 = vmatmul.mubr.bf16.vlgmr.msra.gmra.mrb[12].mxu0 %v1388_v52 }
 0x4df   :  { %v1494_v54 = vpop.f32.mrb[12].mxu0 }
 0x4e0   :  { %v1495_v55 = vadd.f32 %v1678_v53, %v1494_v54  ;;  %v1736_v56 = vpop.f32.mrb[13].mxu0 }
 0x4e1   :  { %v1497_v57 = vpop.f32.mrb[14].mxu0 }
 0x4e2   :  { %v1500_v58 = vmul.f32 0.05, %v1495_v55  ;;  %v1737_v59 = vpop.f32.mrb[15].mxu0 }
 0x4e4   :  { %1986 = vtanh.f32 %v1500_v58 }
 0x4ee   :  { %v1987_v60 = vpop.eup %1986 }
 0x4ef   :  { %v1502_v61 = vmul.f32 24.0, %v1987_v60 }
 0x4f1   :  { %1503 = vst.msk [vmem:[#allocation10] sm:$0xff] %vm159_vm0, %v1502_v61 }
 0x4f2   :  { %2077 = shalt.err (!%p2074_p5)
}
 0x4f3   :  { %s2078_s28 = scalar_lea.hbm %s2326_s12, 128 }
 0x4f4   :  { %p2079_p6 = scmp.ne.s32.totalorder %s2326_s12, %s2078_s28  ;;  %p2082_p7 = scmp.lt.u32.totalorder %s2078_s28, %s2326_s12 }
 0x4f6   :  { %p2084_p8 = pnand %p2082_p7, %p2079_p6 }
 0x4f8   :  { %2087 = shalt.err (!%p2084_p8)
}
 0x4f9   :  { %1513 = dma.vmem_to_hbm [thread:$0]  %s1511_s4, 128, %s2326_s12, [#allocation4]  }
 0x4fa   :  { %2094 = dma.done.wait [#allocation4], 128  }
 0x4fb   :  { %2095 = vsyncadd [#allocation4], 4294967168 }
 0x4fc   :  { %1517 = vsyncpa [#allocation3], 1 }
 0x4fd   :  { %1518 = vsyncpa [#allocation8], 1 }
 0x4fe   :  { %1519 = vsyncpa [#allocation4], 1 }
 0x4ff   :  { %1520 = vsyncpa [#allocation5], 1 }

</bundles_post_ra>
